<compile_context>
chip_gen: v7x
topology: tpu7x:2x2x1
jax: 0.10.0
libtpu: 0.0.40
codegen_flags: <defaults>
</compile_context>

<pallas_src>
import functools

import jax
import jax.numpy as jnp
from jax.experimental import pallas as pl
from jax.experimental.pallas import tpu as pltpu


def _matmul_bn_silu_kernel(x_ref, w_ref, bias_ref, o_ref):
    # x_ref:    (TH*W, Kp)  bf16  pre-packed im2col patches (lane-dense K)
    # w_ref:    (Kp, TN)    bf16  scale-folded weights (resident per cout tile)
    # bias_ref: (1, TN)     f32   folded BN bias
    # o_ref:    (TH*W, TNout)     flat output tile (TNout <= TN)
    acc = jnp.dot(x_ref[...], w_ref[...], preferred_element_type=jnp.float32)
    y = acc + bias_ref[...]
    y = y * jax.nn.sigmoid(y)                      # SiLU (sigmoid on the EUP)
    o_ref[...] = y[:, :o_ref.shape[-1]].astype(o_ref.dtype)


def _tap_conv_bn_silu_kernel(x_ref, w_ref, bias_ref, o_ref, *, k, TH, W):
    # x_ref:    (TH+k-1, Wp, Cin)  bf16  halo row window of the padded input
    # w_ref:    (k*k, Cin, TN)     bf16  scale-folded weights (resident)
    # bias_ref: (1, TN)            f32   folded BN bias
    # o_ref:    (TH*W, TNout)            flat output tile (TNout <= TN)
    Cin = x_ref.shape[-1]
    acc = None
    for kh in range(k):
        for kw in range(k):
            patch = x_ref[kh:kh + TH, kw:kw + W, :].reshape(TH * W, Cin)
            d = jnp.dot(patch, w_ref[kh * k + kw],
                        preferred_element_type=jnp.float32)
            acc = d if acc is None else acc + d
    y = acc + bias_ref[...]
    y = y * jax.nn.sigmoid(y)
    o_ref[...] = y[:, :o_ref.shape[-1]].astype(o_ref.dtype)


def conv_bn_silu(x_nchw, weight_oihw, gamma, beta, running_mean, running_var,
                 eps=1e-3, out_dtype=None, row_tile=None):
    """Fused Conv2d(k, s=1, p=k//2, g=1, bias=False) + BatchNorm2d(eval) + SiLU."""
    N, C1, H, W = x_nchw.shape
    C2, C1w, k, k2 = weight_oihw.shape
    assert C1w == C1 and k == k2, "groups != 1 is not supported"
    assert k % 2 == 1, "only odd kernel sizes (autopad p=k//2) are supported"
    p = k // 2  # autopad, stride = 1

    out_dtype = x_nchw.dtype if out_dtype is None else jnp.dtype(out_dtype)
    out_bytes = jnp.dtype(out_dtype).itemsize

    # ---- output-channel (lane) geometry ------------------------------------
    C2m = pl.cdiv(C2, 128) * 128           # compute width: lane-dense matmul N
    if C2m >= 512 and C2m % 256 == 0:
        TN = 256                           # matches the 256-wide MXU (v6e/v7x)
    elif C2m >= 512:
        TN = 128
    else:
        TN = C2m
    n_cout = C2m // TN
    # stored width: skip the 128-pad for small Cout (HBM write amplification)
    C2out = C2 if C2 < 64 else C2m
    TNout = TN if C2out == C2m else C2out  # n_cout == 1 whenever C2out < C2m

    # ---- fold BatchNorm (eval running stats) into weights / bias -----------
    scale = (gamma / jnp.sqrt(running_var + eps)).astype(jnp.float32)
    bias = (beta - running_mean * scale).astype(jnp.float32)
    bias_p = jnp.pad(bias, (0, C2m - C2)).reshape(1, C2m)
    # OIHW -> (kh, kw, Cin, Cout), scale folded per output channel (f32).
    w_hwio = jnp.transpose(weight_oihw.astype(jnp.float32), (2, 3, 1, 0)) * scale

    small_cin = (k * k * C1) <= 256        # stem convs and all 1x1 convs
    Kc = k * k * C1
    Kp = pl.cdiv(Kc, 128) * 128

    # ---- row tiling from a per-step VMEM estimate ---------------------------
    if small_cin:
        per_pixel = Kp * 2 * 2 + TN * 8 + TNout * out_bytes * 2
        resident = Kp * TN * 2 * 2
    else:
        per_pixel = 2 * C1 * 2 * 2 + TN * 8 + TNout * out_bytes * 2
        resident = k * k * C1 * TN * 2 * 2
    budget = 40 * 1024 * 1024              # fits v7x (64 MiB) with headroom
    if row_tile is not None:
        TH = min(H, int(row_tile))
    else:
        max_px = max(8 * W, (budget - resident) // per_pixel)
        TH = min(H, max(1, min(4096, max_px) // W))
        if N == 1 and TH >= H and H > 8:
            TH = pl.cdiv(H, 2)             # >= 2 row tiles: both TCs get work
    if TH < H:
        TH = max(8, (TH // 8) * 8)         # keep (TH*W) sublane-aligned
    n_rows = pl.cdiv(H, TH)
    H_pad = n_rows * TH

    grid = (N, n_rows, n_cout)             # cout innermost: x block resident
    cparams = pltpu.CompilerParams(
        dimension_semantics=("parallel", "parallel", "parallel"),
        vmem_limit_bytes=48 * 1024 * 1024)
    out_shape = jax.ShapeDtypeStruct((N, H_pad * W, C2out), out_dtype)
    out_spec = pl.BlockSpec((None, TH * W, TNout), lambda n, t, c: (n, t, c))
    bias_spec = pl.BlockSpec((1, TN), lambda n, t, c: (0, c))

    x_nhwc = jnp.transpose(x_nchw, (0, 2, 3, 1)).astype(jnp.bfloat16)

    if small_cin:
        # Wrapper-side im2col: pack the k*k*Cin taps onto the lane axis so the
        # kernel is a single lane-dense MXU matmul (K = Kp >= 128).
        x_sp = jnp.pad(x_nhwc, ((0, 0), (p, p), (p, p), (0, 0)))
        cols = [x_sp[:, kh:kh + H, kw:kw + W, :]
                for kh in range(k) for kw in range(k)]
        patches = cols[0] if len(cols) == 1 else jnp.concatenate(cols, axis=-1)
        patches = jnp.pad(patches,
                          ((0, 0), (0, H_pad - H), (0, 0), (0, Kp - Kc)))
        patches = patches.reshape(N, H_pad * W, Kp)

        w_mat = jnp.pad(w_hwio.reshape(Kc, C2),
                        ((0, Kp - Kc), (0, C2m - C2))).astype(jnp.bfloat16)

        out_flat = pl.pallas_call(
            _matmul_bn_silu_kernel,
            out_shape=out_shape,
            grid=grid,
            in_specs=[
                pl.BlockSpec((None, TH * W, Kp), lambda n, t, c: (n, t, 0)),
                pl.BlockSpec((Kp, TN), lambda n, t, c: (0, c)),
                bias_spec,
            ],
            out_specs=out_spec,
            compiler_params=cparams,
        )(patches, w_mat, bias_p)
    else:
        # Halo row window + per-tap f32 accumulation (no im2col patch blow-up).
        Wp = W + 2 * p
        x_pad = jnp.pad(x_nhwc, ((0, 0), (p, p + (H_pad - H)), (p, p), (0, 0)))
        w_taps = jnp.pad(w_hwio, ((0, 0), (0, 0), (0, 0), (0, C2m - C2)))
        w_taps = w_taps.reshape(k * k, C1, C2m).astype(jnp.bfloat16)

        kernel = functools.partial(_tap_conv_bn_silu_kernel, k=k, TH=TH, W=W)
        out_flat = pl.pallas_call(
            kernel,
            out_shape=out_shape,
            grid=grid,
            in_specs=[
                # Element-offset halo window of TH + k - 1 rows every TH rows.
                pl.BlockSpec((None, pl.Element(TH + k - 1), Wp, C1),
                             lambda n, t, c: (n, t * TH, 0, 0)),
                pl.BlockSpec((k * k, C1, TN), lambda n, t, c: (0, 0, c)),
                bias_spec,
            ],
            out_specs=out_spec,
            compiler_params=cparams,
        )(x_pad, w_taps, bias_p)

    # Drop row / channel padding, flat -> NHWC -> NCHW.
    out = out_flat[:, :H * W, :C2].reshape(N, H, W, C2)
    return jnp.transpose(out, (0, 3, 1, 2))


def _reference(x, w, gamma, beta, mean, var, eps=1e-3):
    scale = gamma / jnp.sqrt(var + eps)
    bias = beta - mean * scale
    # Mimic the kernel: BN scale folded into w, both matmul operands rounded
    # to bf16 (f32 accumulation).
    w_fold = (w * scale[:, None, None, None]).astype(jnp.bfloat16).astype(jnp.float32)
    x_r = x.astype(jnp.bfloat16).astype(jnp.float32)
    p = w.shape[2] // 2
    y = jax.lax.conv_general_dilated(
        x_r, w_fold, window_strides=(1, 1), padding=[(p, p), (p, p)],
        dimension_numbers=("NCHW", "OIHW", "NCHW"),
        preferred_element_type=jnp.float32)
    y = y + bias[None, :, None, None]
    return y * jax.nn.sigmoid(y)


if __name__ == "__main__":
    key = jax.random.PRNGKey(0)
    keys = jax.random.split(key, 12)

    def make_params(kx, kw, kg, kb, km, kv, N, C1, C2, H, W, K):
        x = jax.random.normal(kx, (N, C1, H, W), dtype=jnp.float32)
        w = jax.random.normal(kw, (C2, C1, K, K), dtype=jnp.float32) * 0.1
        g = 1.0 + 0.1 * jax.random.normal(kg, (C2,), dtype=jnp.float32)
        b = 0.1 * jax.random.normal(kb, (C2,), dtype=jnp.float32)
        m = 0.1 * jax.random.normal(km, (C2,), dtype=jnp.float32)
        v = jnp.abs(1.0 + 0.1 * jax.random.normal(kv, (C2,), dtype=jnp.float32))
        return x, w, g, b, m, v

    # Case 1: stem-like small-Cin layer -> wrapper im2col path, f32 output,
    # forced row tiling (2 row tiles of a 16x16 image).
    N, C1, C2, H, W, K = 2, 4, 8, 16, 16, 3
    x, w, g, b, m, v = make_params(*keys[:6], N, C1, C2, H, W, K)
    out = jax.block_until_ready(
        jax.jit(functools.partial(conv_bn_silu, eps=1e-3, row_tile=8))(
            x, w, g, b, m, v))
    ref = _reference(x, w, g, b, m, v)
    assert out.shape == (N, C2, H, W), out.shape
    assert jnp.allclose(out, ref, rtol=1e-3, atol=1e-3), float(
        jnp.max(jnp.abs(out - ref)))

    # Case 2: same layer, bf16 output (halved HBM writeback), auto row tile.
    out_bf = jax.block_until_ready(
        jax.jit(functools.partial(conv_bn_silu, eps=1e-3,
                                  out_dtype=jnp.bfloat16))(x, w, g, b, m, v))
    assert out_bf.dtype == jnp.bfloat16
    assert jnp.allclose(out_bf.astype(jnp.float32), ref, rtol=2e-2, atol=2e-2)

    # Case 3: mid-Cin layer -> per-tap accumulation path; N=1 exercises the
    # megacore row split (2 row tiles), Cout kept unpadded in HBM (32 < 64).
    N3, C13, C23 = 1, 64, 32
    x3, w3, g3, b3, m3, v3 = make_params(*keys[6:12], N3, C13, C23, H, W, K)
    out3 = jax.block_until_ready(
        jax.jit(functools.partial(conv_bn_silu, eps=1e-3))(
            x3, w3, g3, b3, m3, v3))
    ref3 = _reference(x3, w3, g3, b3, m3, v3)
    assert out3.shape == (N3, C23, H, W), out3.shape
    assert jnp.allclose(out3, ref3, rtol=2e-3, atol=2e-3), float(
        jnp.max(jnp.abs(out3 - ref3)))

    print("KERNEL_OK")
</pallas_src>

<mosaic_0001>
module attributes {stable_mosaic.version = 11 : i64} {
  func.func @_matmul_bn_silu_kernel(%arg0: i32, %arg1: i32, %arg2: i32, %arg3: memref<1x128x128xbf16, #tpu.memory_space<vmem>>, %arg4: memref<128x128xbf16, #tpu.memory_space<vmem>>, %arg5: memref<1x128xf32, #tpu.memory_space<vmem>>, %arg6: memref<1x128x8xf32, #tpu.memory_space<vmem>>) attributes {dimension_semantics = [#tpu.dimension_semantics<parallel>, #tpu.dimension_semantics<parallel>, #tpu.dimension_semantics<parallel>], iteration_bounds = array<i64: 2, 2, 1>, scalar_prefetch = 0 : i64, scratch_operands = 0 : i64, tpu.core_type = #tpu.core_type<tc>, window_params = [{transform_indices = @transform_0, window_bounds = array<i64: 1, 128, 128>}, {transform_indices = @transform_1, window_bounds = array<i64: 128, 128>}, {transform_indices = @transform_2, window_bounds = array<i64: 1, 128>}, {transform_indices = @transform_3, window_bounds = array<i64: 1, 128, 8>}]} {
    %c0 = arith.constant 0 : index
    %c0_0 = arith.constant 0 : index
    %c0_1 = arith.constant 0 : index
    %0 = vector.load %arg3[%c0, %c0_0, %c0_1] : memref<1x128x128xbf16, #tpu.memory_space<vmem>>, vector<1x128x128xbf16>
    %1 = vector.shape_cast %0 : vector<1x128x128xbf16> to vector<128x128xbf16>
    %c0_2 = arith.constant 0 : index
    %c0_3 = arith.constant 0 : index
    %2 = vector.load %arg4[%c0_2, %c0_3] : memref<128x128xbf16, #tpu.memory_space<vmem>>, vector<128x128xbf16>
    %cst = arith.constant dense<0.000000e+00> : vector<128x128xf32>
    %3 = tpu.matmul %1, %2, %cst {dimension_numbers = #tpu.dot_dimension_numbers<[1], [0], [0], [1], [0, 0, 1, 1], [], []>} : vector<128x128xbf16>, vector<128x128xbf16>, vector<128x128xf32> -> vector<128x128xf32>
    %c0_4 = arith.constant 0 : index
    %c0_5 = arith.constant 0 : index
    %4 = vector.load %arg5[%c0_4, %c0_5] : memref<1x128xf32, #tpu.memory_space<vmem>>, vector<1x128xf32>
    %5 = vector.broadcast %4 : vector<1x128xf32> to vector<128x128xf32>
    %6 = arith.addf %3, %5 : vector<128x128xf32>
    %7 = arith.negf %6 : vector<128x128xf32>
    %8 = math.exp %7 : vector<128x128xf32>
    %cst_6 = arith.constant 1.000000e+00 : f32
    %9 = vector.broadcast %cst_6 : f32 to vector<128x128xf32>
    %10 = arith.addf %9, %8 : vector<128x128xf32>
    %11 = arith.divf %9, %10 : vector<128x128xf32>
    %12 = arith.mulf %6, %11 : vector<128x128xf32>
    %13 = vector.extract_strided_slice %12 {offsets = [0, 0], sizes = [128, 8], strides = [1, 1]} : vector<128x128xf32> to vector<128x8xf32>
    %c0_7 = arith.constant 0 : index
    %c0_8 = arith.constant 0 : index
    %c0_9 = arith.constant 0 : index
    %14 = vector.load %arg6[%c0_7, %c0_8, %c0_9] : memref<1x128x8xf32, #tpu.memory_space<vmem>>, vector<1x128x8xf32>
    %15 = vector.shape_cast %14 : vector<1x128x8xf32> to vector<128x8xf32>
    %16 = vector.shape_cast %13 : vector<128x8xf32> to vector<1x128x8xf32>
    tpu.vector_store %arg6[%c0_7, %c0_8, %c0_9], %16 {strides = array<i32>} : memref<1x128x8xf32, #tpu.memory_space<vmem>>, vector<1x128x8xf32>,
    return
  }
  func.func @transform_0(%arg0: i32, %arg1: i32, %arg2: i32) -> (i32, i32, i32) {
    %c0_i32 = arith.constant 0 : i32
    %c0_i32_0 = arith.constant 0 : i32
    return %arg0, %arg1, %c0_i32 : i32, i32, i32
  }
  func.func @transform_1(%arg0: i32, %arg1: i32, %arg2: i32) -> (i32, i32) {
    %c0_i32 = arith.constant 0 : i32
    %c0_i32_0 = arith.constant 0 : i32
    return %c0_i32, %arg2 : i32, i32
  }
  func.func @transform_2(%arg0: i32, %arg1: i32, %arg2: i32) -> (i32, i32) {
    %c0_i32 = arith.constant 0 : i32
    %c0_i32_0 = arith.constant 0 : i32
    return %c0_i32, %arg2 : i32, i32
  }
  func.func @transform_3(%arg0: i32, %arg1: i32, %arg2: i32) -> (i32, i32, i32) {
    %c0_i32 = arith.constant 0 : i32
    return %arg0, %arg1, %arg2 : i32, i32, i32
  }
}

</mosaic_0001>

<bundles_post_ra>
// kernel: conv_bn_silu.1
= control target key start
LH: loop header
LB: loop body
LE: loop exit
PB: predicated region body
PF: predicated region fallthrough
CT: control target
= control target key end

     0   :  { %s1040_s12 = smov 0   ;;  %s1042_s13 = smov 0   ;;  %s1251_s0 = inlined_call_operand.vmem [shape: bf16[2,256,128], index: 0, kind: input, shape index: {}]   ;;  %s1252_s1 = inlined_call_operand.vmem [shape: bf16[128,128], index: 1, kind: input, shape index: {}]   ;;  %s1253_s2 = inlined_call_operand.vmem [shape: f32[1,128], index: 2, kind: input, shape index: {}]   ;;  %s1254_s3 = inlined_call_operand.vmem [shape: f32[2,256,8], index: 3, kind: output, shape index: {}]  }
   0x1   :  { %s1044_s14 = smov 0   ;;  %s1046_s15 = smov 0  }
   0x2   :  { %s1048_s16 = smov 0  }
   0x3 LB: > { %s28_s17 = sadd.s32 1, %s1010_s14  ;;  %s32_s18 = sadd.s32 1, %s1014_s15  ;;  %s1018_s16 = sphi %s1048_s16, %s13_s16   ;;  %s1014_s15 = sphi %s1046_s15, %s1258_s15   ;;  %s1010_s14 = sphi %s1044_s14, %s1257_s14   ;;  %s1006_s13 = sphi %s1042_s13, %s1256_s13   ;;  %s1002_s12 = sphi %s1040_s12, %s1255_s12  }
   0x4   : > { %p30_p0 = scmp.ge.s32.totalorder %s28_s17, 2  ;;  %p754_p1 = scmp.ge.s32.totalorder %s1018_s16, 1 }
   0x5   : > { %p184_p2 = scmp.lt.s32.totalorder %s1018_s16, 5 }
   0x6   : > { %s1260_s17 = smov (%p30_p0, %s28_s17), 0  ;;  %s1262_s18 = smov (!%p30_p0, %s32_s18), %s1014_s15 }
   0x7   : > { %p185_p3 = pnand %p754_p1, %p184_p2  ;;  %p34_p4 = scmp.ge.s32.totalorder %s1262_s18, 2 }
   0x8   : > { %v900_v0 = vld [vmem:[%s1252_s1] sm:$0xff] (!%p185_p3)   ;;  %s755_s21 = sshll.u32 (!%p185_p3), %s1002_s12, 4  ;;  %v901_v1 = vld [vmem:[%s1252_s1 + $0x8] sm:$0xff] (!%p185_p3)   ;;  %p227_p5 = scmp.lt.s32.totalorder (!%p185_p3), %s1006_s13, 1  ;;  %v902_v2 = vld [vmem:[%s1252_s1 + $0x10] sm:$0xff] (!%p185_p3)   ;;  %vm601_vm0 = vcmask (!%p185_p3), 64512  }
   0x9   : > { %s1264_s18 = smov (%p34_p4, %s1262_s18), 0  ;;  %188 = sbr.rel (%p185_p3) target bundleno = 313 (0x139), region = 32 }
   0xa   : > { %812 = vmatprep.subr.bf16.mxu0 (!%p185_p3), %v900_v0  ;;  %844 = vmatprep.subr.bf16.mxu1 (!%p185_p3), %v900_v0  ;;  %p229_p6 = scmp.lt.s32.totalorder (!%p185_p3), %s755_s21, 31  ;;  %v903_v3 = vld [vmem:[%s1252_s1 + $0x18] sm:$0xff] (!%p185_p3)   ;;  %v904_v6 = vld [vmem:[%s1252_s1 + $0x20] sm:$0xff] (!%p185_p3)   ;;  %v905_v7 = vld [vmem:[%s1252_s1 + $0x28] sm:$0xff] (!%p185_p3)  }
   0xb   : > { %813 = vmatpush3.bf16.msra.mxu0 (!%p185_p3), %v900_v0  ;;  %852 = vmatpush3.bf16.msra.mxu1 (!%p185_p3), %v900_v0  ;;  %v906_v8 = vld [vmem:[%s1252_s1 + $0x30] sm:$0xff] (!%p185_p3)   ;;  %v907_v9 = vld [vmem:[%s1252_s1 + $0x38] sm:$0xff] (!%p185_p3)   ;;  %v1116_v16 = vld [vmem:[%s1253_s2] ss:$0 sm:$0xff] (!%p185_p3) }
   0xc   : > { %814 = vmatprep.subr.bf16.mxu0 (!%p185_p3), %v901_v1  ;;  %845 = vmatprep.subr.bf16.mxu1 (!%p185_p3), %v901_v1 }
   0xf   : > { %815 = vmatpush3.bf16.msra.mxu0 (!%p185_p3), %v901_v1  ;;  %853 = vmatpush3.bf16.msra.mxu1 (!%p185_p3), %v901_v1 }
  0x10   : > { %s1266_s13 = smov (!%p227_p5, %s1006_s13), 1  ;;  %s1268_s21 = smov (!%p229_p6, %s755_s21), 31  ;;  %816 = vmatprep.subr.bf16.mxu0 %v902_v2  ;;  %846 = vmatprep.subr.bf16.mxu1 %v902_v2 }
  0x11   : > { %s756_s26 = sshll.u32 %s1266_s13, 5 }
  0x12   : > { %s1082_s27 = sadd.s32 %s756_s26, %s1268_s21 }
  0x13   : > { %s757_s28 = sshll.u32 %s1082_s27, 2  ;;  %817 = vmatpush3.bf16.msra.mxu0 %v902_v2  ;;  %854 = vmatpush3.bf16.msra.mxu1 %v902_v2  ;;  %s760_s22 = sshll.u32 %s1082_s27, 3 }
  0x14   : > { %s1091_s6 = scalar_lea.vmem %s1251_s0, %s757_s28  ;;  %818 = vmatprep.subr.bf16.mxu0 %v903_v3  ;;  %847 = vmatprep.subr.bf16.mxu1 %v903_v3  ;;  %s1184_s25 = scalar_lea.vmem %s1254_s3, %s760_s22 }
  0x15   : > { %v908_v4 = vld [vmem:[%s1091_s6] sm:$0xff]   ;;  %v910_v10 = vld [vmem:[%s1091_s6 + $0x8] sm:$0xff]   ;;  %v912_v12 = vld [vmem:[%s1091_s6 + $0x10] sm:$0xff]  }
  0x16   : > { %v909_v5 = vld [vmem:[%s1091_s6 + $0x20] sm:$0xff]   ;;  %828 = vmatprep.mubr.bf16.mxu0 %v908_v4  ;;  %v911_v11 = vld [vmem:[%s1091_s6 + $0x28] sm:$0xff]   ;;  %v913_v13 = vld [vmem:[%s1091_s6 + $0x30] sm:$0xff]  }
  0x17   : > { %836 = vmatprep.mubr.bf16.mxu1 %v909_v5  ;;  %819 = vmatpush3.bf16.msra.mxu0 %v903_v3  ;;  %v914_v14 = vld [vmem:[%s1091_s6 + $0x18] sm:$0xff]  }
  0x18   : > { %855 = vmatpush3.bf16.msra.mxu1 %v903_v3  ;;  %820 = vmatprep.subr.bf16.mxu0 %v904_v6  ;;  %v915_v15 = vld [vmem:[%s1091_s6 + $0x38] sm:$0xff]  }
  0x19   : > { %848 = vmatprep.subr.bf16.mxu1 %v904_v6 }
  0x1b   : > { %821 = vmatpush3.bf16.msra.mxu0 %v904_v6 }
  0x1c   : > { %856 = vmatpush3.bf16.msra.mxu1 %v904_v6  ;;  %822 = vmatprep.subr.bf16.mxu0 %v905_v7 }
  0x1d   : > { %849 = vmatprep.subr.bf16.mxu1 %v905_v7 }
  0x1f   : > { %823 = vmatpush3.bf16.msra.mxu0 %v905_v7 }
  0x20   : > { %857 = vmatpush3.bf16.msra.mxu1 %v905_v7  ;;  %824 = vmatprep.subr.bf16.mxu0 %v906_v8 }
  0x21   : > { %850 = vmatprep.subr.bf16.mxu1 %v906_v8 }
  0x23   : > { %825 = vmatpush3.bf16.msra.mxu0 %v906_v8 }
  0x24   : > { %858 = vmatpush3.bf16.msra.mxu1 %v906_v8  ;;  %826 = vmatprep.subr.bf16.mxu0 %v907_v9 }
  0x25   : > { %851 = vmatprep.subr.bf16.mxu1 %v907_v9 }
  0x27   : > { %827 = vmatpush3.bf16.msra.mxu0 %v907_v9 }
  0x28   : > { %859 = vmatpush3.bf16.msra.mxu1 %v907_v9 }
  0x2a   : > { %829 = vmatmul.mubr.bf16.vlgmr.msra.gmra.mrb[0].mxu0 %v910_v10 }
  0x2b   : > { %837 = vmatmul.mubr.bf16.vlgmr.msra.gmra.mrb[0].mxu1 %v911_v11  ;;  %832 = vmatprep.mubr.bf16.mxu0 %v912_v12 }
  0x2c   : > { %840 = vmatprep.mubr.bf16.mxu1 %v913_v13 }
  0x32   : > { %833 = vmatmul.mubr.bf16.gmra.mrb[4].mxu0 %v914_v14 }
  0x33   : > { %841 = vmatmul.mubr.bf16.gmra.mrb[4].mxu1 %v915_v15 }
  0xfd   : > { %v830_v17 = vpop.f32.mrb[0].mxu0 }
  0xfe   : > { %v838_v18 = vpop.f32.mrb[0].mxu1  ;;  %v1119_v19 = vadd.f32 %v830_v17, %v1116_v16  ;;  %v426_v21 = vpop.f32.mrb[1].mxu0 }
  0xff   : > { %v1122_v20 = vadd.f32 %v838_v18, %v1116_v16  ;;  %v458_v22 = vpop.f32.mrb[1].mxu1  ;;  %v1125_v23 = vadd.f32 %v1116_v16, %v426_v21  ;;  %v831_v25 = vpop.f32.mrb[2].mxu0 }
 0x100   : > { %v1128_v24 = vadd.f32 %v1116_v16, %v458_v22  ;;  %v839_v26 = vpop.f32.mrb[2].mxu1  ;;  %v780_v27 = vmul.f32 -1.442695, %v1119_v19  ;;  %v1133_v29 = vadd.f32 %v831_v25, %v1116_v16  ;;  %v429_v31 = vpop.f32.mrb[3].mxu0 }
 0x101   : > { %v788_v28 = vmul.f32 -1.442695, %v1122_v20  ;;  %v1136_v30 = vadd.f32 %v839_v26, %v1116_v16  ;;  %v461_v32 = vpop.f32.mrb[3].mxu1  ;;  %v778_v33 = vmul.f32 -1.442695, %v1125_v23  ;;  %v1141_v35 = vadd.f32 %v1116_v16, %v429_v31 }
 0x102   : > { %v786_v34 = vmul.f32 -1.442695, %v1128_v24  ;;  %v1144_v36 = vadd.f32 %v1116_v16, %v461_v32  ;;  %916 = vpow2.f32 %v780_v27  ;;  %v781_v37 = vmul.f32 -1.442695, %v1133_v29 }
 0x103   : > { %918 = vpow2.f32 %v788_v28  ;;  %v789_v38 = vmul.f32 -1.442695, %v1136_v30  ;;  %v779_v39 = vmul.f32 -1.442695, %v1141_v35 }
 0x104   : > { %920 = vpow2.f32 %v778_v33  ;;  %v787_v40 = vmul.f32 -1.442695, %v1144_v36 }
 0x105   : > { %922 = vpow2.f32 %v786_v34  ;;  %v834_v41 = vpop.f32.mrb[4].mxu0 }
 0x106   : > { %v842_v42 = vpop.f32.mrb[4].mxu1  ;;  %924 = vpow2.f32 %v781_v37  ;;  %v1151_v43 = vadd.f32 %v834_v41, %v1116_v16  ;;  %v442_v45 = vpop.f32.mrb[5].mxu0 }
 0x107   : > { %v1154_v44 = vadd.f32 %v842_v42, %v1116_v16  ;;  %v474_v46 = vpop.f32.mrb[5].mxu1  ;;  %926 = vpow2.f32 %v789_v38  ;;  %v1157_v47 = vadd.f32 %v1116_v16, %v442_v45  ;;  %v835_v49 = vpop.f32.mrb[6].mxu0 }
 0x108   : > { %v1160_v48 = vadd.f32 %v1116_v16, %v474_v46  ;;  %v843_v50 = vpop.f32.mrb[6].mxu1  ;;  %928 = vpow2.f32 %v779_v39  ;;  %v784_v51 = vmul.f32 -1.442695, %v1151_v43  ;;  %v1165_v53 = vadd.f32 %v835_v49, %v1116_v16  ;;  %v445_v54 = vpop.f32.mrb[7].mxu0 }
 0x109   : > { %v792_v52 = vmul.f32 -1.442695, %v1154_v44  ;;  %v477_v55 = vpop.f32.mrb[7].mxu1  ;;  %930 = vpow2.f32 %v787_v40  ;;  %v782_v56 = vmul.f32 -1.442695, %v1157_v47  ;;  %v1171_v12 = vadd.f32 %v843_v50, %v1116_v16 }
 0x10a   : > { %v790_v57 = vmul.f32 -1.442695, %v1160_v48  ;;  %932 = vpow2.f32 %v784_v51  ;;  %v785_v58 = vmul.f32 -1.442695, %v1165_v53  ;;  %v1174_v15 = vadd.f32 %v1116_v16, %v445_v54 }
 0x10b   : > { %934 = vpow2.f32 %v792_v52  ;;  %v1178_v21 = vadd.f32 %v1116_v16, %v477_v55  ;;  %v793_v28 = vmul.f32 -1.442695, %v1171_v12 }
 0x10c   : > { %v917_v59 = vpop.eup %916  ;;  %936 = vpow2.f32 %v782_v56  ;;  %v783_v32 = vmul.f32 -1.442695, %v1174_v15 }
 0x10d   : > { %v919_v60 = vpop.eup %918  ;;  %v539_v61 = vadd.f32 1.0, %v917_v59  ;;  %938 = vpow2.f32 %v790_v57  ;;  %v791_v37 = vmul.f32 -1.442695, %v1178_v21 }
 0x10e   : > { %v921_v62 = vpop.eup %920  ;;  %v547_v63 = vadd.f32 1.0, %v919_v60  ;;  %940 = vpow2.f32 %v785_v58 }
 0x10f   : > { %v923_v0 = vpop.eup %922  ;;  %942 = vrcp.f32 %v539_v61  ;;  %v537_v1 = vadd.f32 1.0, %v921_v62 }
 0x110   : > { %v925_v2 = vpop.eup %924  ;;  %944 = vrcp.f32 %v547_v63  ;;  %v545_v3 = vadd.f32 1.0, %v923_v0 }
 0x111   : > { %v927_v4 = vpop.eup %926  ;;  %946 = vrcp.f32 %v537_v1  ;;  %v540_v5 = vadd.f32 1.0, %v925_v2 }
 0x112   : > { %v929_v6 = vpop.eup %928  ;;  %948 = vrcp.f32 %v545_v3  ;;  %v548_v7 = vadd.f32 1.0, %v927_v4 }
 0x113   : > { %v931_v8 = vpop.eup %930  ;;  %950 = vrcp.f32 %v540_v5  ;;  %v538_v9 = vadd.f32 1.0, %v929_v6 }
 0x114   : > { %v933_v10 = vpop.eup %932  ;;  %952 = vrcp.f32 %v548_v7  ;;  %v546_v11 = vadd.f32 1.0, %v931_v8 }
 0x115   : > { %v935_v13 = vpop.eup %934  ;;  %954 = vrcp.f32 %v538_v9  ;;  %v543_v14 = vadd.f32 1.0, %v933_v10 }
 0x116   : > { %v937_v17 = vpop.eup %936  ;;  %956 = vrcp.f32 %v546_v11  ;;  %v551_v18 = vadd.f32 1.0, %v935_v13 }
 0x117   : > { %v939_v22 = vpop.eup %938  ;;  %958 = vrcp.f32 %v543_v14  ;;  %v541_v25 = vadd.f32 1.0, %v937_v17 }
 0x118   : > { %v941_v26 = vpop.eup %940  ;;  %960 = vrcp.f32 %v551_v18  ;;  %v549_v27 = vadd.f32 1.0, %v939_v22 }
 0x119   : > { %v943_v31 = vpop.eup %942  ;;  %962 = vrcp.f32 %v541_v25  ;;  %v544_v16 = vadd.f32 1.0, %v941_v26 }
 0x11a   : > { %v945_v33 = vpop.eup %944  ;;  %v587_v34 = vmul.f32 %v943_v31, %v1119_v19  ;;  %964 = vrcp.f32 %v549_v27 }
 0x11b   : > { %v947_v38 = vpop.eup %946  ;;  %v595_v39 = vmul.f32 %v945_v33, %v1122_v20  ;;  %966 = vrcp.f32 %v544_v16 }
 0x11c   : > { %v949_v40 = vpop.eup %948  ;;  %604 = vst.msk [vmem:[%s1184_s25 + $0x10] sm:$0xff] %vm601_vm0, %v587_v34  ;;  %v585_v41 = vmul.f32 %v947_v38, %v1125_v23  ;;  %968 = vpow2.f32 %v793_v28 }
 0x11d   : > { %v951_v42 = vpop.eup %950  ;;  %612 = vst.msk [vmem:[%s1184_s25 + $0x50] sm:$0xff] %vm601_vm0, %v595_v39  ;;  %v593_v19 = vmul.f32 %v949_v40, %v1128_v24  ;;  %970 = vpow2.f32 %v783_v32 }
 0x11e   : > { %v953_v45 = vpop.eup %952  ;;  %602 = vst.msk [vmem:[%s1184_s25] sm:$0xff] %vm601_vm0, %v585_v41  ;;  %v588_v20 = vmul.f32 %v951_v42, %v1133_v29  ;;  %972 = vpow2.f32 %v791_v37 }
 0x11f   : > { %v955_v46 = vpop.eup %954  ;;  %610 = vst.msk [vmem:[%s1184_s25 + $0x40] sm:$0xff] %vm601_vm0, %v593_v19  ;;  %v596_v23 = vmul.f32 %v953_v45, %v1136_v30 }
 0x120   : > { %v957_v49 = vpop.eup %956  ;;  %605 = vst.msk [vmem:[%s1184_s25 + $0x18] sm:$0xff] %vm601_vm0, %v588_v20  ;;  %v586_v24 = vmul.f32 %v955_v46, %v1141_v35 }
 0x121   : > { %v959_v50 = vpop.eup %958  ;;  %613 = vst.msk [vmem:[%s1184_s25 + $0x58] sm:$0xff] %vm601_vm0, %v596_v23  ;;  %v594_v51 = vmul.f32 %v957_v49, %v1144_v36 }
 0x122   : > { %v961_v29 = vpop.eup %960  ;;  %603 = vst.msk [vmem:[%s1184_s25 + $0x8] sm:$0xff] %vm601_vm0, %v586_v24  ;;  %v591_v52 = vmul.f32 %v959_v50, %v1151_v43 }
 0x123   : > { %v963_v54 = vpop.eup %962  ;;  %611 = vst.msk [vmem:[%s1184_s25 + $0x48] sm:$0xff] %vm601_vm0, %v594_v51  ;;  %v599_v30 = vmul.f32 %v961_v29, %v1154_v44 }
 0x124   : > { %v965_v55 = vpop.eup %964  ;;  %608 = vst.msk [vmem:[%s1184_s25 + $0x30] sm:$0xff] %vm601_vm0, %v591_v52  ;;  %v589_v35 = vmul.f32 %v963_v54, %v1157_v47 }
 0x125   : > { %v967_v56 = vpop.eup %966  ;;  %616 = vst.msk [vmem:[%s1184_s25 + $0x70] sm:$0xff] %vm601_vm0, %v599_v30  ;;  %v597_v36 = vmul.f32 %v965_v55, %v1160_v48 }
 0x126   : > { %v969_v57 = vpop.eup %968  ;;  %606 = vst.msk [vmem:[%s1184_s25 + $0x20] sm:$0xff] %vm601_vm0, %v589_v35  ;;  %v592_v43 = vmul.f32 %v967_v56, %v1165_v53 }
 0x127   : > { %v971_v58 = vpop.eup %970  ;;  %614 = vst.msk [vmem:[%s1184_s25 + $0x60] sm:$0xff] %vm601_vm0, %v597_v36  ;;  %v552_v44 = vadd.f32 1.0, %v969_v57 }
 0x128   : > { %v973_v59 = vpop.eup %972  ;;  %609 = vst.msk [vmem:[%s1184_s25 + $0x38] sm:$0xff] %vm601_vm0, %v592_v43  ;;  %v542_v47 = vadd.f32 1.0, %v971_v58 }
 0x129   : > { %974 = vrcp.f32 %v552_v44  ;;  %v550_v60 = vadd.f32 1.0, %v973_v59 }
 0x12a   : > { %976 = vrcp.f32 %v542_v47 }
 0x12b   : > { %978 = vrcp.f32 %v550_v60 }
 0x133   : > { %v975_v48 = vpop.eup %974 }
 0x134   : > { %v977_v61 = vpop.eup %976  ;;  %v600_v62 = vmul.f32 %v975_v48, %v1171_v12 }
 0x135   : > { %v979_v53 = vpop.eup %978  ;;  %v590_v63 = vmul.f32 %v977_v61, %v1174_v15 }
 0x136   : > { %617 = vst.msk [vmem:[%s1184_s25 + $0x78] sm:$0xff] %vm601_vm0, %v600_v62  ;;  %v598_v0 = vmul.f32 %v979_v53, %v1178_v21 }
 0x137   : > { %607 = vst.msk [vmem:[%s1184_s25 + $0x28] sm:$0xff] %vm601_vm0, %v590_v63 }
 0x138   : > { %615 = vst.msk [vmem:[%s1184_s25 + $0x68] sm:$0xff] %vm601_vm0, %v598_v0 }
 0x139 PF: > { %s13_s16 = sadd.s32 1, %s1018_s16   ;;  %s1255_s12 = smov %s1010_s14 }
 0x13a   : > { %p10_p7 = scmp.ge.s32.totalorder %s13_s16, 6   ;;  %s1256_s13 = smov %s1014_s15 }
 0x13b   : > { %s1257_s14 = smov %s1260_s17  ;;  %s1258_s15 = smov %s1264_s18 }
 0x13c   :  { %12 = sbr.rel (!%p10_p7) target bundleno = 3 (0x3), region = 68 }

</bundles_post_ra>
